<compile_context>
chip_gen: v6e
topology: v6e:2x2x1
jax: 0.10.0
libtpu: 0.0.40
codegen_flags: <defaults>
</compile_context>

<pallas_src>
import functools

import jax
import jax.numpy as jnp
from jax.experimental import pallas as pl
from jax.experimental.pallas import tpu as pltpu


def _round_up(x, m):
    return (x + m - 1) // m * m


def critic_kernel(x_ref, w_in_ref, b1_ref, w2h_ref, b2_ref, w3_ref, b3_ref,
                  out_ref, *, fcs1):
    """Transposed MLP: features on sublanes, batch on lanes.

    x_ref    : (ds+da, tile_b)      pre-concatenated [state; actions]^T tile
    w_in_ref : (fcs1+fcs2, ds+da)   block-diag [[W1^T, 0], [0, W2a^T]]
    b1_ref   : (fcs1, 1)            fc1 bias (column)
    w2h_ref  : (fcs2, fcs1)         W2_h^T (h1-facing half of fc2)
    b2_ref   : (fcs2, 1)            fc2 bias (column)
    w3_ref   : (fcs2, 1)            fc3 weight (column)
    b3_ref   : (1, 1)               fc3 bias
    out_ref  : (1, tile_b)          q, lane-dense
    """
    # --- fused first MXU pass:
    #   z[:fcs1]  = W1^T  @ state^T     (fc1 pre-activation)
    #   z[fcs1:]  = W2a^T @ actions^T   (actions branch of fc2)
    z = jnp.dot(w_in_ref[...], x_ref[...], preferred_element_type=jnp.float32)

    # --- fc1 bias + relu  (slice lands on the 128-sublane tile boundary)
    h1 = jnp.maximum(z[:fcs1, :] + b1_ref[...], 0.0)

    # --- fc2: h1 branch on the MXU, actions branch already in z[fcs1:]
    h2 = jnp.dot(w2h_ref[...], h1.astype(w2h_ref.dtype),
                 preferred_element_type=jnp.float32)
    h2 = jnp.maximum(h2 + z[fcs1:, :] + b2_ref[...], 0.0)

    # --- fc3 as a sublane reduction (keeps the N=1 matmul off the MXU and the
    #     result is naturally lane-dense).
    q = jnp.sum(h2 * w3_ref[...], axis=0, keepdims=True) + b3_ref[...]
    out_ref[...] = q.astype(out_ref.dtype)


def prepare_params(params, matmul_dtype=jnp.bfloat16):
    """One-time preprocessing of raw (PyTorch-layout) params into the
    kernel-facing layout.  Call once; pass the result to critic_forward."""
    w1, b1, w2, b2, w3, b3 = (params["w1"], params["b1"], params["w2"],
                              params["b2"], params["w3"], params["b3"])
    ds = w1.shape[0]
    fcs1 = w1.shape[1]
    fcs2 = w2.shape[1]
    da = w2.shape[0] - fcs1

    w2_h = w2[:fcs1, :]          # h1-facing half of fc2
    w2_a = w2[fcs1:, :]          # actions-facing half of fc2

    # Block-diagonal, transposed input weight: (fcs1+fcs2, ds+da)
    w_in_t = jnp.zeros((fcs1 + fcs2, ds + da), jnp.float32)
    w_in_t = w_in_t.at[:fcs1, :ds].set(w1.T)
    w_in_t = w_in_t.at[fcs1:, ds:].set(w2_a.T)

    return {
        "w_in_t": w_in_t.astype(matmul_dtype),
        "w2h_t": w2_h.T.astype(matmul_dtype),
        # Elementwise/bias math stays f32 (v5e has no bf16 VPU).
        "b1": b1.reshape(fcs1, 1).astype(jnp.float32),
        "b2": b2.reshape(fcs2, 1).astype(jnp.float32),
        "w3": w3.reshape(fcs2, 1).astype(jnp.float32),
        "b3": b3.reshape(1, 1).astype(jnp.float32),
    }


def critic_forward(state, actions, prep, *, tile_b=1024):
    """state: [B, state_size*num_agents], actions: [B, action_size*num_agents].
    prep: output of prepare_params()."""
    B = state.shape[0]
    w_in_t = prep["w_in_t"]
    w2h_t = prep["w2h_t"]
    b1, b2, w3, b3 = prep["b1"], prep["b2"], prep["w3"], prep["b3"]

    d_in = w_in_t.shape[1]
    fcs1 = w2h_t.shape[1]
    fcs2 = w2h_t.shape[0]
    assert state.shape[1] + actions.shape[1] == d_in

    mm_dtype = w_in_t.dtype
    # Pre-concatenated, transposed input: (ds+da, B).  Batch lives on lanes.
    x_t = jnp.concatenate([state, actions], axis=1).astype(mm_dtype).T

    # --- batch tile selection (no padding; ragged last tile is masked).
    tile_b = max(128, _round_up(tile_b, 128))
    if B <= tile_b:
        if B >= 256:
            # Split into >= 2 grid steps so both v7x TensorCores get work.
            tb = _round_up(pl.cdiv(B, 2), 128)
        else:
            tb = B                     # single tile; lane dim == full dim
    else:
        tb = tile_b
    grid = (pl.cdiv(B, tb),)

    def batch_map(i):
        return (0, i)

    def const_map(i):
        return (0, 0)

    in_specs = [
        pl.BlockSpec((d_in, tb), batch_map),        # x^T tile (batch on lanes)
        pl.BlockSpec(w_in_t.shape, const_map),      # block-diag W_in^T
        pl.BlockSpec(b1.shape, const_map),          # b1 column
        pl.BlockSpec(w2h_t.shape, const_map),       # W2_h^T
        pl.BlockSpec(b2.shape, const_map),          # b2 column
        pl.BlockSpec(w3.shape, const_map),          # w3 column
        pl.BlockSpec(b3.shape, const_map),          # b3
    ]
    out_specs = pl.BlockSpec((1, tb), batch_map)    # lane-dense q row

    flops = 2 * B * (d_in * (fcs1 + fcs2) + fcs1 * fcs2 + fcs2)
    act_bytes = (x_t.size * x_t.dtype.itemsize) + B * 4
    wgt_bytes = sum(int(a.size) * a.dtype.itemsize
                    for a in (w_in_t, w2h_t, b1, b2, w3, b3))
    cost = pl.CostEstimate(flops=flops, transcendentals=0,
                           bytes_accessed=act_bytes + wgt_bytes)

    # TODO(synk): on v7x, experiment with pltpu.CORE_PARALLEL on the batch axis.
    out = pl.pallas_call(
        functools.partial(critic_kernel, fcs1=fcs1),
        out_shape=jax.ShapeDtypeStruct((1, B), jnp.float32),
        grid=grid,
        in_specs=in_specs,
        out_specs=out_specs,
        compiler_params=pltpu.CompilerParams(
            dimension_semantics=("parallel",),
        ),
        cost_estimate=cost,
    )(x_t, w_in_t, b1, w2h_t, b2, w3, b3)

    return out.reshape(B, 1)


def init_params(key, state_size, action_size, num_agents,
                fcs1_units=128, fcs2_units=64):
    """Deterministic synthetic parameter init (same shapes as the PyTorch module)."""
    k1, k2, k3, k4, k5, k6 = jax.random.split(key, 6)
    in1 = state_size * num_agents
    in2 = fcs1_units + action_size * num_agents
    return {
        "w1": jax.random.normal(k1, (in1, fcs1_units), jnp.float32) * 0.05,
        "b1": jax.random.normal(k2, (fcs1_units,), jnp.float32) * 0.05,
        "w2": jax.random.normal(k3, (in2, fcs2_units), jnp.float32) * 0.05,
        "b2": jax.random.normal(k4, (fcs2_units,), jnp.float32) * 0.05,
        "w3": jax.random.normal(k5, (fcs2_units, 1), jnp.float32) * 0.05,
        "b3": jax.random.normal(k6, (1,), jnp.float32) * 0.05,
    }


def reference_forward(state, actions, params):
    """Plain-JAX reference matching the PyTorch forward."""
    h1 = jax.nn.relu(state @ params["w1"] + params["b1"])
    x = jnp.concatenate([h1, actions], axis=1)
    h2 = jax.nn.relu(x @ params["w2"] + params["b2"])
    return h2 @ params["w3"] + params["b3"]


if __name__ == "__main__":
    # Small shapes consistent with the module's forward.
    batch = 8
    state_size = 8
    action_size = 2
    num_agents = 2

    key = jax.random.PRNGKey(0)
    kp, ks, ka = jax.random.split(key, 3)

    params = init_params(kp, state_size, action_size, num_agents)
    state = jax.random.normal(ks, (batch, state_size * num_agents), jnp.float32)
    actions = jax.random.normal(ka, (batch, action_size * num_agents), jnp.float32)
    ref = reference_forward(state, actions, params)

    fwd = jax.jit(functools.partial(critic_forward, tile_b=1024))

    # --- f32 MXU-operand path (tight tolerance) ---
    prep_f32 = prepare_params(params, matmul_dtype=jnp.float32)
    out_f32 = jax.block_until_ready(fwd(state, actions, prep_f32))
    assert out_f32.shape == (batch, 1), out_f32.shape
    assert jnp.allclose(out_f32, ref, atol=1e-3, rtol=1e-3), (out_f32, ref)

    # --- default bf16 MXU-operand path (f32 accumulation; looser tolerance) ---
    prep_bf16 = prepare_params(params)           # bf16 default
    out_bf16 = jax.block_until_ready(fwd(state, actions, prep_bf16))
    assert out_bf16.shape == (batch, 1)
    assert jnp.allclose(out_bf16, ref, atol=1e-2, rtol=1e-2), (out_bf16, ref)

    # --- ragged batch spanning several grid steps (no-pad / masked-tile path) ---
    big_b = 1037
    ks2, ka2 = jax.random.split(jax.random.PRNGKey(1), 2)
    state_big = jax.random.normal(ks2, (big_b, state_size * num_agents), jnp.float32)
    actions_big = jax.random.normal(ka2, (big_b, action_size * num_agents), jnp.float32)
    ref_big = reference_forward(state_big, actions_big, params)

    out_big_f32 = jax.block_until_ready(fwd(state_big, actions_big, prep_f32))
    assert out_big_f32.shape == (big_b, 1)
    assert jnp.allclose(out_big_f32, ref_big, atol=1e-3, rtol=1e-3)

    out_big_bf16 = jax.block_until_ready(fwd(state_big, actions_big, prep_bf16))
    assert jnp.allclose(out_big_bf16, ref_big, atol=1e-2, rtol=1e-2)

    print("KERNEL_OK")
</pallas_src>

<mosaic_0001>
module attributes {stable_mosaic.version = 11 : i64} {
  func.func @critic_kernel(%arg0: i32, %arg1: memref<20x8xf32, #tpu.memory_space<vmem>>, %arg2: memref<192x20xf32, #tpu.memory_space<vmem>>, %arg3: memref<128x1xf32, #tpu.memory_space<vmem>>, %arg4: memref<64x128xf32, #tpu.memory_space<vmem>>, %arg5: memref<64x1xf32, #tpu.memory_space<vmem>>, %arg6: memref<64x1xf32, #tpu.memory_space<vmem>>, %arg7: memref<1x1xf32, #tpu.memory_space<vmem>>, %arg8: memref<1x8xf32, #tpu.memory_space<vmem>>) attributes {dimension_semantics = [#tpu.dimension_semantics<parallel>], iteration_bounds = array<i64: 1>, scalar_prefetch = 0 : i64, scratch_operands = 0 : i64, tpu.core_type = #tpu.core_type<tc>, window_params = [{transform_indices = @transform_0, window_bounds = array<i64: 20, 8>}, {pipeline_mode = #tpu.pipeline_mode<synchronous>, transform_indices = @transform_1, window_bounds = array<i64: 192, 20>}, {pipeline_mode = #tpu.pipeline_mode<synchronous>, transform_indices = @transform_2, window_bounds = array<i64: 128, 1>}, {pipeline_mode = #tpu.pipeline_mode<synchronous>, transform_indices = @transform_3, window_bounds = array<i64: 64, 128>}, {pipeline_mode = #tpu.pipeline_mode<synchronous>, transform_indices = @transform_4, window_bounds = array<i64: 64, 1>}, {pipeline_mode = #tpu.pipeline_mode<synchronous>, transform_indices = @transform_5, window_bounds = array<i64: 64, 1>}, {pipeline_mode = #tpu.pipeline_mode<synchronous>, transform_indices = @transform_6, window_bounds = array<i64: 1, 1>}, {transform_indices = @transform_7, window_bounds = array<i64: 1, 8>}]} {
    %c0 = arith.constant 0 : index
    %c0_0 = arith.constant 0 : index
    %0 = vector.load %arg2[%c0, %c0_0] : memref<192x20xf32, #tpu.memory_space<vmem>>, vector<192x20xf32>
    %c0_1 = arith.constant 0 : index
    %c0_2 = arith.constant 0 : index
    %1 = vector.load %arg1[%c0_1, %c0_2] : memref<20x8xf32, #tpu.memory_space<vmem>>, vector<20x8xf32>
    %cst = arith.constant dense<0.000000e+00> : vector<192x8xf32>
    %2 = tpu.matmul %0, %1, %cst {dimension_numbers = #tpu.dot_dimension_numbers<[1], [0], [0], [1], [0, 0, 1, 1], [], []>} : vector<192x20xf32>, vector<20x8xf32>, vector<192x8xf32> -> vector<192x8xf32>
    %3 = vector.extract_strided_slice %2 {offsets = [0, 0], sizes = [128, 8], strides = [1, 1]} : vector<192x8xf32> to vector<128x8xf32>
    %c0_3 = arith.constant 0 : index
    %c0_4 = arith.constant 0 : index
    %4 = vector.load %arg3[%c0_3, %c0_4] : memref<128x1xf32, #tpu.memory_space<vmem>>, vector<128x1xf32>
    %5 = vector.broadcast %4 : vector<128x1xf32> to vector<128x8xf32>
    %6 = arith.addf %3, %5 : vector<128x8xf32>
    %cst_5 = arith.constant 0.000000e+00 : f32
    %7 = vector.broadcast %cst_5 : f32 to vector<128x8xf32>
    %8 = arith.maximumf %6, %7 : vector<128x8xf32>
    %c0_6 = arith.constant 0 : index
    %c0_7 = arith.constant 0 : index
    %9 = vector.load %arg4[%c0_6, %c0_7] : memref<64x128xf32, #tpu.memory_space<vmem>>, vector<64x128xf32>
    %cst_8 = arith.constant dense<0.000000e+00> : vector<64x8xf32>
    %10 = tpu.matmul %9, %8, %cst_8 {dimension_numbers = #tpu.dot_dimension_numbers<[1], [0], [0], [1], [0, 0, 1, 1], [], []>} : vector<64x128xf32>, vector<128x8xf32>, vector<64x8xf32> -> vector<64x8xf32>
    %11 = vector.extract_strided_slice %2 {offsets = [128, 0], sizes = [64, 8], strides = [1, 1]} : vector<192x8xf32> to vector<64x8xf32>
    %12 = arith.addf %10, %11 : vector<64x8xf32>
    %c0_9 = arith.constant 0 : index
    %c0_10 = arith.constant 0 : index
    %13 = vector.load %arg5[%c0_9, %c0_10] : memref<64x1xf32, #tpu.memory_space<vmem>>, vector<64x1xf32>
    %14 = vector.broadcast %13 : vector<64x1xf32> to vector<64x8xf32>
    %15 = arith.addf %12, %14 : vector<64x8xf32>
    %cst_11 = arith.constant 0.000000e+00 : f32
    %16 = vector.broadcast %cst_11 : f32 to vector<64x8xf32>
    %17 = arith.maximumf %15, %16 : vector<64x8xf32>
    %c0_12 = arith.constant 0 : index
    %c0_13 = arith.constant 0 : index
    %18 = vector.load %arg6[%c0_12, %c0_13] : memref<64x1xf32, #tpu.memory_space<vmem>>, vector<64x1xf32>
    %19 = vector.broadcast %18 : vector<64x1xf32> to vector<64x8xf32>
    %20 = arith.mulf %17, %19 : vector<64x8xf32>
    %cst_14 = arith.constant dense<0.000000e+00> : vector<8xf32>
    %21 = vector.multi_reduction <add>, %20, %cst_14 [0] : vector<64x8xf32> to vector<8xf32>
    %22 = vector.shape_cast %21 : vector<8xf32> to vector<1x8xf32>
    %c0_15 = arith.constant 0 : index
    %c0_16 = arith.constant 0 : index
    %23 = vector.load %arg7[%c0_15, %c0_16] : memref<1x1xf32, #tpu.memory_space<vmem>>, vector<1x1xf32>
    %24 = vector.broadcast %23 : vector<1x1xf32> to vector<1x8xf32>
    %25 = arith.addf %22, %24 : vector<1x8xf32>
    %c0_17 = arith.constant 0 : index
    %c0_18 = arith.constant 0 : index
    %26 = vector.load %arg8[%c0_17, %c0_18] : memref<1x8xf32, #tpu.memory_space<vmem>>, vector<1x8xf32>
    tpu.vector_store %arg8[%c0_17, %c0_18], %25 {strides = array<i32>} : memref<1x8xf32, #tpu.memory_space<vmem>>, vector<1x8xf32>,
    return
  }
  func.func @transform_0(%arg0: i32) -> (i32, i32) {
    %c0_i32 = arith.constant 0 : i32
    %c0_i32_0 = arith.constant 0 : i32
    return %c0_i32, %arg0 : i32, i32
  }
  func.func @transform_1(%arg0: i32) -> (i32, i32) {
    %c0_i32 = arith.constant 0 : i32
    %c0_i32_0 = arith.constant 0 : i32
    %c0_i32_1 = arith.constant 0 : i32
    return %c0_i32, %c0_i32_0 : i32, i32
  }
  func.func @transform_2(%arg0: i32) -> (i32, i32) {
    %c0_i32 = arith.constant 0 : i32
    %c0_i32_0 = arith.constant 0 : i32
    %c0_i32_1 = arith.constant 0 : i32
    return %c0_i32, %c0_i32_0 : i32, i32
  }
  func.func @transform_3(%arg0: i32) -> (i32, i32) {
    %c0_i32 = arith.constant 0 : i32
    %c0_i32_0 = arith.constant 0 : i32
    %c0_i32_1 = arith.constant 0 : i32
    return %c0_i32, %c0_i32_0 : i32, i32
  }
  func.func @transform_4(%arg0: i32) -> (i32, i32) {
    %c0_i32 = arith.constant 0 : i32
    %c0_i32_0 = arith.constant 0 : i32
    %c0_i32_1 = arith.constant 0 : i32
    return %c0_i32, %c0_i32_0 : i32, i32
  }
  func.func @transform_5(%arg0: i32) -> (i32, i32) {
    %c0_i32 = arith.constant 0 : i32
    %c0_i32_0 = arith.constant 0 : i32
    %c0_i32_1 = arith.constant 0 : i32
    return %c0_i32, %c0_i32_0 : i32, i32
  }
  func.func @transform_6(%arg0: i32) -> (i32, i32) {
    %c0_i32 = arith.constant 0 : i32
    %c0_i32_0 = arith.constant 0 : i32
    %c0_i32_1 = arith.constant 0 : i32
    return %c0_i32, %c0_i32_0 : i32, i32
  }
  func.func @transform_7(%arg0: i32) -> (i32, i32) {
    %c0_i32 = arith.constant 0 : i32
    %c0_i32_0 = arith.constant 0 : i32
    return %c0_i32, %arg0 : i32, i32
  }
}

</mosaic_0001>

<bundles_post_ra>
// kernel: critic_forward.1
= control target key start
LH: loop header
LB: loop body
LE: loop exit
PB: predicated region body
PF: predicated region fallthrough
CT: control target
= control target key end

     0   :  { %s1209_s0 = inlined_call_operand.vmem [shape: f32[20,8], index: 0, kind: input, shape index: {}]   ;;  %s1210_s1 = inlined_call_operand.vmem [shape: f32[192,20], index: 1, kind: input, shape index: {}]   ;;  %s1211_s2 = inlined_call_operand.vmem [shape: f32[128,1], index: 2, kind: input, shape index: {}]   ;;  %s1212_s3 = inlined_call_operand.vmem [shape: f32[64,128], index: 3, kind: input, shape index: {}]   ;;  %s1213_s4 = inlined_call_operand.vmem [shape: f32[64,1], index: 4, kind: input, shape index: {}]   ;;  %s1214_s5 = inlined_call_operand.vmem [shape: f32[64,1], index: 5, kind: input, shape index: {}]   ;;  %s1215_s6 = inlined_call_operand.<no memory space> [shape: f32[1,1], index: 6, kind: input, shape index: {}]   ;;  %s1216_s7 = inlined_call_operand.hbm [shape: f32[1,8], index: 7, kind: output, shape index: {}]  }
   0x1   :  { %v12_v0 = vstv %s1215_s6 }
   0x2   :  { %13 = vst [vmem:[#allocation2] sm:$0x1] %v12_v0 }
   0x3   :  { %v55_v1 = vld [vmem:[%s1209_s0 + $0x10] sm:$0xf]  ;;  %vm129_vm0 = vcmask 1043456   ;;  %v54_v2 = vld [vmem:[%s1209_s0 + $0x8] sm:$0xff]  ;;  %vm56_vm1 = vcmask 162816   ;;  %v29_v3 = vld [vmem:[%s1210_s1] sm:$0xff] }
   0x4   :  { %804 = vmatprep.subr.msk.mxu0 %vm129_vm0, %v55_v1  ;;  %v53_v4 = vld [vmem:[%s1209_s0] sm:$0xff]  ;;  %810 = vmatprep.mubr.msk.f32.mxu0 %vm56_vm1, %v29_v3  ;;  %v916_v5 = vmov 0   ;;  %v30_v6 = vld [vmem:[%s1210_s1 + $0x8] sm:$0xff]  ;;  %v31_v7 = vld [vmem:[%s1210_s1 + $0x10] sm:$0xff] }
   0x5   :  { %805 = vmatpush3.msk.msra.mxu0 %vm129_vm0, %v55_v1  ;;  %892 = vset.pattern.permute.xlu0 %v916_v5  ;;  %v333_v8 = vld [vmem:[%s1211_s2 + $0x78] sm:$0xff]  ;;  %v331_v9 = vld [vmem:[%s1211_s2 + $0x68] sm:$0xff]  ;;  %v332_v11 = vld [vmem:[%s1211_s2 + $0x70] sm:$0xff] }
   0x6   :  { %806 = vmatprep.subr.mxu0 %v54_v2  ;;  %893 = vset.pattern.permute.xlu1 %v916_v5  ;;  %v32_v10 = vld [vmem:[%s1210_s1 + $0x18] sm:$0xff]  ;;  %v33_v12 = vld [vmem:[%s1210_s1 + $0x20] sm:$0xff]  ;;  %v34_v14 = vld [vmem:[%s1210_s1 + $0x28] sm:$0xff] }
   0x7   :  { %807 = vmatpush3.msra.mxu0 %v54_v2  ;;  %411 = vperm.xlu0 %892, %v333_v8   ;;  %v330_v13 = vld [vmem:[%s1211_s2 + $0x60] sm:$0xff]  ;;  %v329_v15 = vld [vmem:[%s1211_s2 + $0x58] sm:$0xff]  ;;  %v35_v16 = vld [vmem:[%s1210_s1 + $0x30] sm:$0xff] }
   0x8   :  { %808 = vmatprep.subr.mxu0 %v53_v4  ;;  %401 = vperm.xlu1 %893, %v331_v9   ;;  %v328_v17 = vld [vmem:[%s1211_s2 + $0x50] sm:$0xff]  ;;  %v36_v18 = vld [vmem:[%s1210_s1 + $0x38] sm:$0xff]  ;;  %v327_v19 = vld [vmem:[%s1211_s2 + $0x48] sm:$0xff] }
   0x9   :  { %809 = vmatpush3.msra.mxu0 %v53_v4  ;;  %v37_v20 = vld [vmem:[%s1210_s1 + $0x40] sm:$0xff] }
   0xa   :  { %811 = vmatmul.mubr.msk.f32.vlgmr.msra.gmra.mxu0 %vm56_vm1, %v30_v6  ;;  %v326_v21 = vld [vmem:[%s1211_s2 + $0x40] sm:$0xff] }
   0xb   :  { %813 = vmatprep.mubr.msk.f32.mxu0 %vm56_vm1, %v31_v7  ;;  %406 = vperm.xlu0 %892, %v332_v11  }
   0xc   :  { %396 = vperm.xlu1 %893, %v330_v13  }
   0xe   :  { %814 = vmatmul.mubr.msk.f32.gmra.mxu0 %vm56_vm1, %v32_v10 }
   0xf   :  { %816 = vmatprep.mubr.msk.f32.mxu0 %vm56_vm1, %v33_v12  ;;  %391 = vperm.xlu0 %892, %v329_v15  }
  0x10   :  { %386 = vperm.xlu1 %893, %v328_v17  }
  0x12   :  { %817 = vmatmul.mubr.msk.f32.gmra.mxu0 %vm56_vm1, %v34_v14 }
  0x13   :  { %819 = vmatprep.mubr.msk.f32.mxu0 %vm56_vm1, %v35_v16 }
  0x14   :  { %14 = vsyncpa [#allocation4], 0  ;;  %381 = vperm.xlu0 %892, %v327_v19   ;;  %v38_v22 = vld [vmem:[%s1210_s1 + $0x48] sm:$0xff]  ;;  %v325_v23 = vld [vmem:[%s1211_s2 + $0x38] sm:$0xff]  ;;  %376 = vperm.xlu1 %893, %v326_v21   ;;  %vm679_vm2 = vcmask 64512   ;;  %vm712_vm3 = vcmask 57344  }
  0x15   :  { %v39_v24 = vld [vmem:[%s1210_s1 + $0x50] sm:$0xff]  ;;  %v40_v26 = vld [vmem:[%s1210_s1 + $0x58] sm:$0xff]  ;;  %v323_v27 = vld [vmem:[%s1211_s2 + $0x28] sm:$0xff] }
  0x16   :  { %820 = vmatmul.mubr.msk.f32.gmra.mxu0 %vm56_vm1, %v36_v18  ;;  %v324_v25 = vld [vmem:[%s1211_s2 + $0x30] sm:$0xff]  ;;  %v41_v28 = vld [vmem:[%s1210_s1 + $0x60] sm:$0xff]  ;;  %v42_v30 = vld [vmem:[%s1210_s1 + $0x68] sm:$0xff] }
  0x17   :  { %822 = vmatprep.mubr.msk.f32.mxu0 %vm56_vm1, %v37_v20  ;;  %v322_v29 = vld [vmem:[%s1211_s2 + $0x20] sm:$0xff]  ;;  %v321_v31 = vld [vmem:[%s1211_s2 + $0x18] sm:$0xff]  ;;  %v43_v32 = vld [vmem:[%s1210_s1 + $0x70] sm:$0xff] }
  0x18   :  { %371 = vperm.xlu0 %892, %v325_v23   ;;  %366 = vperm.xlu1 %893, %v324_v25   ;;  %v320_v33 = vld [vmem:[%s1211_s2 + $0x10] sm:$0xff]  ;;  %v44_v34 = vld [vmem:[%s1210_s1 + $0x78] sm:$0xff]  ;;  %v319_v35 = vld [vmem:[%s1211_s2 + $0x8] sm:$0xff] }
  0x19   :  { %v318_v36 = vld [vmem:[%s1211_s2] sm:$0xff]  ;;  %v560_v38 = vld [vmem:[%s1213_s4 + $0x8] sm:$0xff]  ;;  %v561_v39 = vld [vmem:[%s1213_s4 + $0x10] sm:$0xff] }
  0x1a   :  { %823 = vmatmul.mubr.msk.f32.gmra.mxu0 %vm56_vm1, %v38_v22  ;;  %v559_v37 = vld [vmem:[%s1213_s4] sm:$0xff]  ;;  %v562_v40 = vld [vmem:[%s1213_s4 + $0x18] sm:$0xff]  ;;  %v624_v42 = vld [vmem:[%s1214_s5 + $0x8] sm:$0xff] }
  0x1b   :  { %825 = vmatprep.mubr.msk.f32.mxu0 %vm56_vm1, %v39_v24  ;;  %v623_v41 = vld [vmem:[%s1214_s5] sm:$0xff]  ;;  %v625_v44 = vld [vmem:[%s1214_s5 + $0x10] sm:$0xff]  ;;  %v564_v45 = vld [vmem:[%s1213_s4 + $0x28] sm:$0xff] }
  0x1c   :  { %361 = vperm.xlu0 %892, %v323_v27   ;;  %356 = vperm.xlu1 %893, %v322_v29   ;;  %v563_v43 = vld [vmem:[%s1213_s4 + $0x20] sm:$0xff]  ;;  %v626_v46 = vld [vmem:[%s1214_s5 + $0x18] sm:$0xff]  ;;  %v565_v47 = vld [vmem:[%s1213_s4 + $0x30] sm:$0xff] }
  0x1d   :  { %v627_v48 = vld [vmem:[%s1214_s5 + $0x20] sm:$0xff]  ;;  %v566_v49 = vld [vmem:[%s1213_s4 + $0x38] sm:$0xff]  ;;  %v628_v50 = vld [vmem:[%s1214_s5 + $0x28] sm:$0xff] }
  0x1e   :  { %826 = vmatmul.mubr.msk.f32.gmra.mxu0 %vm56_vm1, %v40_v26  ;;  %v629_v51 = vld [vmem:[%s1214_s5 + $0x30] sm:$0xff]  ;;  %v630_v52 = vld [vmem:[%s1214_s5 + $0x38] sm:$0xff]  ;;  %v701_v53 = vld [vmem:[#allocation2] sm:$0x1] }
  0x1f   :  { %828 = vmatprep.mubr.msk.f32.mxu0 %vm56_vm1, %v41_v28  ;;  %v45_v54 = vld [vmem:[%s1210_s1 + $0x80] sm:$0xff]  ;;  %v46_v55 = vld [vmem:[%s1210_s1 + $0x88] sm:$0xff]  ;;  %v47_v57 = vld [vmem:[%s1210_s1 + $0x90] sm:$0xff] }
  0x20   :  { %351 = vperm.xlu0 %892, %v321_v31   ;;  %346 = vperm.xlu1 %893, %v320_v33   ;;  %v446_v56 = vld [vmem:[%s1212_s3] sm:$0xff]  ;;  %v48_v58 = vld [vmem:[%s1210_s1 + $0x98] sm:$0xff]  ;;  %v50_v60 = vld [vmem:[%s1210_s1 + $0xa8] sm:$0xff] }
  0x21   :  { %878 = vmatprep.mubr.f32.mxu1 %v446_v56  ;;  %v49_v59 = vld [vmem:[%s1210_s1 + $0xa0] sm:$0xff]  ;;  %v51_v61 = vld [vmem:[%s1210_s1 + $0xb0] sm:$0xff]  ;;  %v52_v62 = vld [vmem:[%s1210_s1 + $0xb8] sm:$0xff] }
  0x22   :  { %829 = vmatmul.mubr.msk.f32.gmra.mxu0 %vm56_vm1, %v42_v30 }
  0x23   :  { %831 = vmatprep.mubr.msk.f32.mxu0 %vm56_vm1, %v43_v32 }
  0x24   :  { %341 = vperm.xlu0 %892, %v319_v35   ;;  %336 = vperm.xlu1 %893, %v318_v36  }
  0x26   :  { %832 = vmatmul.mubr.msk.f32.gmra.mxu0 %vm56_vm1, %v44_v34 }
  0x27   :  { %834 = vmatprep.mubr.msk.f32.mxu0 %vm56_vm1, %v45_v54 }
  0x28   :  { %569 = vperm.xlu0 %892, %v559_v37   ;;  %574 = vperm.xlu1 %893, %v560_v38  }
  0x2a   :  { %835 = vmatmul.mubr.msk.f32.gmra.mxu0 %vm56_vm1, %v46_v55 }
  0x2b   :  { %837 = vmatprep.mubr.msk.f32.mxu0 %vm56_vm1, %v47_v57 }
  0x2c   :  { %579 = vperm.xlu0 %892, %v561_v39   ;;  %584 = vperm.xlu1 %893, %v562_v40  }
  0x2e   :  { %838 = vmatmul.mubr.msk.f32.gmra.mxu0 %vm56_vm1, %v48_v58 }
  0x2f   :  { %840 = vmatprep.mubr.msk.f32.mxu0 %vm56_vm1, %v49_v59 }
  0x30   :  { %633 = vperm.xlu0 %892, %v623_v41   ;;  %638 = vperm.xlu1 %893, %v624_v42  }
  0x32   :  { %841 = vmatmul.mubr.msk.f32.gmra.mxu0 %vm56_vm1, %v50_v60 }
  0x33   :  { %843 = vmatprep.mubr.msk.f32.mxu0 %vm56_vm1, %v51_v61 }
  0x34   :  { %589 = vperm.xlu0 %892, %v563_v43   ;;  %643 = vperm.xlu1 %893, %v625_v44  }
  0x36   :  { %844 = vmatmul.mubr.msk.f32.gmra.mxu0 %vm56_vm1, %v52_v62 }
  0x38   :  { %594 = vperm.xlu0 %892, %v564_v45   ;;  %648 = vperm.xlu1 %893, %v626_v46  }
  0x3c   :  { %599 = vperm.xlu0 %892, %v565_v47   ;;  %653 = vperm.xlu1 %893, %v627_v48  }
  0x40   :  { %604 = vperm.xlu0 %892, %v566_v49   ;;  %658 = vperm.xlu1 %893, %v628_v50  }
  0x44   :  { %663 = vperm.xlu0 %892, %v629_v51   ;;  %668 = vperm.xlu1 %893, %v630_v52  }
  0x48   :  { %704 = vperm.xlu0 %892, %v701_v53  }
  0x82   :  { %v412_v5 = vpop.permute.xlu0 %411 }
  0x83   :  { %v402_v7 = vpop.permute.xlu1 %401 }
  0x86   :  { %v407_v10 = vpop.permute.xlu0 %406 }
  0x87   :  { %v397_v12 = vpop.permute.xlu1 %396 }
  0x8a   :  { %v392_v15 = vpop.permute.xlu0 %391 }
  0x8b   :  { %v387_v17 = vpop.permute.xlu1 %386 }
  0x8f   :  { %v382_v21 = vpop.permute.xlu0 %381  ;;  %v377_v26 = vpop.permute.xlu1 %376 }
  0x93   :  { %v372_v31 = vpop.permute.xlu0 %371  ;;  %v367_v34 = vpop.permute.xlu1 %366 }
  0x97   :  { %v362_v39 = vpop.permute.xlu0 %361  ;;  %v357_v42 = vpop.permute.xlu1 %356 }
  0x9b   :  { %v352_v47 = vpop.permute.xlu0 %351  ;;  %v347_v50 = vpop.permute.xlu1 %346 }
  0x9f   :  { %v342_v55 = vpop.permute.xlu0 %341  ;;  %v337_v58 = vpop.permute.xlu1 %336 }
  0xca   :  { %v1165_v63 = vpop.f32.mrf.mxu0 }
  0xcb   :  { %v415_v56 = vadd.f32 %v1165_v63, %v342_v55  ;;  %v448_v63 = vld [vmem:[%s1212_s3 + $0x10] sm:$0xff] }
  0xcc   :  { %v1167_v0 = vpop.f32.mrf.mxu0 }
  0xcd   :  { %v414_v59 = vadd.f32 %v337_v58, %v1167_v0  ;;  %v431_v61 = vmax.f32 %v415_v56, 0.0  ;;  %v449_v0 = vld [vmem:[%s1212_s3 + $0x18] sm:$0xff] }
  0xce   :  { %v1169_v1 = vpop.f32.mrf.mxu0 }
  0xcf   :  { %v417_v51 = vadd.f32 %v1169_v1, %v352_v47  ;;  %v430_v62 = vmax.f32 %v414_v59, 0.0  ;;  %v447_v1 = vld [vmem:[%s1212_s3 + $0x8] sm:$0xff] }
  0xd0   :  { %v1171_v2 = vpop.f32.mrf.mxu0 }
  0xd1   :  { %v416_v53 = vadd.f32 %v347_v50, %v1171_v2  ;;  %v433_v57 = vmax.f32 %v417_v51, 0.0  ;;  %v450_v2 = vld [vmem:[%s1212_s3 + $0x20] sm:$0xff] }
  0xd2   :  { %v818_v3 = vpop.f32.mrf.mxu0 }
  0xd3   :  { %v419_v45 = vadd.f32 %v818_v3, %v362_v39  ;;  %v432_v60 = vmax.f32 %v416_v53, 0.0  ;;  %v451_v3 = vld [vmem:[%s1212_s3 + $0x28] sm:$0xff] }
  0xd4   :  { %v219_v4 = vpop.f32.mrf.mxu0 }
  0xd5   :  { %v418_v48 = vadd.f32 %v357_v42, %v219_v4  ;;  %v435_v52 = vmax.f32 %v419_v45, 0.0  ;;  %v452_v4 = vld [vmem:[%s1212_s3 + $0x30] sm:$0xff] }
  0xd6   :  { %v821_v6 = vpop.f32.mrf.mxu0 }
  0xd7   :  { %v421_v40 = vadd.f32 %v821_v6, %v372_v31  ;;  %v434_v54 = vmax.f32 %v418_v48, 0.0  ;;  %v570_v6 = vpop.permute.xlu0 %569 }
  0xd8   :  { %v229_v8 = vpop.f32.mrf.mxu0 }
  0xd9   :  { %v420_v43 = vadd.f32 %v367_v34, %v229_v8  ;;  %v437_v46 = vmax.f32 %v421_v40, 0.0 }
  0xda   :  { %v824_v9 = vpop.f32.mrf.mxu0 }
  0xdb   :  { %v423_v35 = vadd.f32 %v824_v9, %v382_v21  ;;  %v436_v49 = vmax.f32 %v420_v43, 0.0  ;;  %v580_v8 = vpop.permute.xlu0 %579 }
  0xdc   :  { %v239_v11 = vpop.f32.mrf.mxu0 }
  0xdd   :  { %v422_v37 = vadd.f32 %v377_v26, %v239_v11  ;;  %v439_v41 = vmax.f32 %v423_v35, 0.0 }
  0xde   :  { %v827_v13 = vpop.f32.mrf.mxu0 }
  0xdf   :  { %v425_v29 = vadd.f32 %v827_v13, %v392_v15  ;;  %v438_v44 = vmax.f32 %v422_v37, 0.0  ;;  %v634_v11 = vpop.permute.xlu0 %633 }
  0xe0   :  { %v249_v14 = vpop.f32.mrf.mxu0 }
  0xe1   :  { %v424_v32 = vadd.f32 %v387_v17, %v249_v14  ;;  %v441_v36 = vmax.f32 %v425_v29, 0.0 }
  0xe2   :  { %v830_v16 = vpop.f32.mrf.mxu0 }
  0xe3   :  { %v427_v23 = vadd.f32 %v830_v16, %v402_v7  ;;  %v440_v38 = vmax.f32 %v424_v32, 0.0  ;;  %v575_v7 = vpop.permute.xlu1 %574  ;;  %v590_v15 = vpop.permute.xlu0 %589 }
  0xe4   :  { %v259_v18 = vpop.f32.mrf.mxu0 }
  0xe5   :  { %v426_v27 = vadd.f32 %v397_v12, %v259_v18  ;;  %v443_v30 = vmax.f32 %v427_v23, 0.0 }
  0xe6   :  { %v833_v19 = vpop.f32.mrf.mxu0 }
  0xe7   :  { %v429_v20 = vadd.f32 %v833_v19, %v412_v5  ;;  %v442_v33 = vmax.f32 %v426_v27, 0.0  ;;  %v453_v5 = vld [vmem:[%s1212_s3 + $0x38] sm:$0xff]  ;;  %v585_v9 = vpop.permute.xlu1 %584  ;;  %v595_v19 = vpop.permute.xlu0 %594  ;;  %s917_s3 = smov [#allocation3]  }
  0xe8   :  { %v269_v22 = vpop.f32.mrf.mxu0  ;;  %s720_s28 = sshll.u32 %s917_s3, 4  ;;  %s721_s28 = int_to_ptr.vmem [resolvable:$true] %s720_s28 }
  0xe9   :  { %v445_v24 = vmax.f32 %v429_v20, 0.0  ;;  %v428_v25 = vadd.f32 %v407_v10, %v269_v22  ;;  %s894_s29 = scalar_lea.vmem %s721_s28, 16  ;;  %s898_s30 = scalar_lea.vmem %s721_s28, 32 }
  0xea   :  { %v836_v10 = vpop.f32.mrf.mxu0  ;;  %p895_p0 = scmp.ne.s32.totalorder %s721_s28, %s894_s29  ;;  %p899_p1 = scmp.lt.s32.totalorder %s721_s28, %s721_s28 }
  0xeb   :  { %v444_v28 = vmax.f32 %v428_v25, 0.0  ;;  %846 = vmatprep.subr.mxu1 %v445_v24  ;;  %v639_v12 = vpop.permute.xlu1 %638  ;;  %v600_v32 = vpop.permute.xlu0 %599  ;;  %p900_p2 = scmp.lt.s32.totalorder %s898_s30, %s894_s29 }
  0xec   :  { %847 = vmatpush3.msra.mxu1 %v445_v24  ;;  %v279_v13 = vpop.f32.mrf.mxu0 }
  0xed   :  { %848 = vmatprep.subr.mxu1 %v444_v28  ;;  %p901_p3 = por %p900_p2, %p899_p1 }
  0xee   :  { %849 = vmatpush3.msra.mxu1 %v444_v28  ;;  %v839_v14 = vpop.f32.mrf.mxu0 }
  0xef   :  { %850 = vmatprep.subr.mxu1 %v443_v30  ;;  %v644_v16 = vpop.permute.xlu1 %643  ;;  %v605_v51 = vpop.permute.xlu0 %604  ;;  %p902_p4 = pnand %p901_p3, %p895_p0 }
  0xf0   :  { %851 = vmatpush3.msra.mxu1 %v443_v30  ;;  %v289_v17 = vpop.f32.mrf.mxu0 }
  0xf1   :  { %852 = vmatprep.subr.mxu1 %v442_v33 }
  0xf2   :  { %853 = vmatpush3.msra.mxu1 %v442_v33  ;;  %v842_v23 = vpop.f32.mrf.mxu0 }
  0xf3   :  { %854 = vmatprep.subr.mxu1 %v441_v36  ;;  %v649_v20 = vpop.permute.xlu1 %648 }
  0xf4   :  { %855 = vmatpush3.msra.mxu1 %v441_v36  ;;  %v299_v31 = vpop.f32.mrf.mxu0 }
  0xf5   :  { %856 = vmatprep.subr.mxu1 %v440_v38 }
  0xf6   :  { %857 = vmatpush3.msra.mxu1 %v440_v38  ;;  %v845_v43 = vpop.f32.mrf.mxu0 }
  0xf7   :  { %858 = vmatprep.subr.mxu1 %v439_v41  ;;  %v654_v33 = vpop.permute.xlu1 %653 }
  0xf8   :  { %859 = vmatpush3.msra.mxu1 %v439_v41  ;;  %v309_v59 = vpop.f32.mrf.mxu0 }
  0xf9   :  { %860 = vmatprep.subr.mxu1 %v438_v44 }
  0xfa   :  { %861 = vmatpush3.msra.mxu1 %v438_v44 }
  0xfb   :  { %862 = vmatprep.subr.mxu1 %v437_v46 }
  0xfc   :  { %863 = vmatpush3.msra.mxu1 %v437_v46 }
  0xfd   :  { %864 = vmatprep.subr.mxu1 %v436_v49 }
  0xfe   :  { %865 = vmatpush3.msra.mxu1 %v436_v49 }
  0xff   :  { %866 = vmatprep.subr.mxu1 %v435_v52 }
 0x100   :  { %867 = vmatpush3.msra.mxu1 %v435_v52  ;;  %v659_v52 = vpop.permute.xlu1 %658 }
 0x101   :  { %868 = vmatprep.subr.mxu1 %v434_v54 }
 0x102   :  { %869 = vmatpush3.msra.mxu1 %v434_v54 }
 0x103   :  { %870 = vmatprep.subr.mxu1 %v433_v57 }
 0x104   :  { %871 = vmatpush3.msra.mxu1 %v433_v57 }
 0x105   :  { %872 = vmatprep.subr.mxu1 %v432_v60 }
 0x106   :  { %873 = vmatpush3.msra.mxu1 %v432_v60 }
 0x107   :  { %874 = vmatprep.subr.mxu1 %v431_v61 }
 0x108   :  { %875 = vmatpush3.msra.mxu1 %v431_v61 }
 0x109   :  { %876 = vmatprep.subr.mxu1 %v430_v62 }
 0x10a   :  { %877 = vmatpush3.msra.mxu1 %v430_v62 }
 0x10b   :  { %879 = vmatmul.mubr.f32.vlgmr.msra.gmra.mxu1 %v447_v1 }
 0x10c   :  { %881 = vmatprep.mubr.f32.mxu1 %v448_v63 }
 0x10f   :  { %882 = vmatmul.mubr.f32.gmra.mxu1 %v449_v0 }
 0x110   :  { %884 = vmatprep.mubr.f32.mxu1 %v450_v2 }
 0x113   :  { %885 = vmatmul.mubr.f32.gmra.mxu1 %v451_v3 }
 0x114   :  { %887 = vmatprep.mubr.f32.mxu1 %v452_v4 }
 0x117   :  { %888 = vmatmul.mubr.f32.gmra.mxu1 %v453_v5 }
 0x1cb   :  { %v880_v18 = vpop.f32.mrf.mxu1 }
 0x1cc   :  { %v526_v21 = vadd.f32 %v880_v18, %v836_v10  ;;  %v664_v10 = vpop.permute.xlu0 %663 }
 0x1cd   :  { %v520_v22 = vpop.f32.mrf.mxu1 }
 0x1ce   :  { %v608_v24 = vadd.f32 %v575_v7, %v526_v21  ;;  %v521_v25 = vadd.f32 %v520_v22, %v279_v13 }
 0x1cf   :  { %v883_v26 = vpop.f32.mrf.mxu1 }
 0x1d0   :  { %v616_v27 = vmax.f32 %v608_v24, 0.0  ;;  %v607_v28 = vadd.f32 %v570_v6, %v521_v25  ;;  %v536_v29 = vadd.f32 %v883_v26, %v839_v14 }
 0x1d1   :  { %v530_v30 = vpop.f32.mrf.mxu1 }
 0x1d2   :  { %v615_v34 = vmax.f32 %v607_v28, 0.0  ;;  %v610_v35 = vadd.f32 %v585_v9, %v536_v29  ;;  %v531_v36 = vadd.f32 %v530_v30, %v289_v17  ;;  %v672_v38 = vmul.f32 %v639_v12, %v616_v27  ;;  %v705_v28 = vpop.permute.xlu0 %704 }
 0x1d3   :  { %v886_v37 = vpop.f32.mrf.mxu1 }
 0x1d4   :  { %v671_v39 = vmul.f32 %v634_v11, %v615_v34  ;;  %v618_v40 = vmax.f32 %v610_v35, 0.0  ;;  %v609_v41 = vadd.f32 %v580_v8, %v531_v36  ;;  %v546_v42 = vadd.f32 %v886_v37, %v842_v23  ;;  %v669_v11 = vpop.permute.xlu1 %668 }
 0x1d5   :  { %v540_v44 = vpop.f32.mrf.mxu1  ;;  %v681_v53 = vsel %vm679_vm2, %v672_v38, 0.0 }
 0x1d6   :  { %v680_v45 = vsel %vm679_vm2, %v671_v39, 0.0  ;;  %v617_v46 = vmax.f32 %v609_v41, 0.0  ;;  %v541_v47 = vadd.f32 %v540_v44, %v299_v31  ;;  %v674_v48 = vmul.f32 %v649_v20, %v618_v40 }
 0x1d7   :  { %v612_v49 = vadd.f32 %v595_v19, %v546_v42  ;;  %v889_v50 = vpop.f32.mrf.mxu1  ;;  %v682_v57 = vadd.f32 %v681_v53, %v680_v45  ;;  %v707_v20 = vlaneseq }
 0x1d8   :  { %v673_v54 = vmul.f32 %v644_v16, %v617_v46  ;;  %v611_v55 = vadd.f32 %v590_v15, %v541_v47  ;;  %v556_v56 = vadd.f32 %v889_v50, %v845_v43  ;;  %v685_v0 = vsel %vm679_vm2, %v674_v48, 0.0 }
 0x1d9   :  { %v620_v58 = vmax.f32 %v612_v49, 0.0  ;;  %v550_v60 = vpop.f32.mrf.mxu1  ;;  %v708_v23 = vshrl.u32 %v707_v20, 7 }
 0x1da   :  { %v683_v61 = vsel %vm679_vm2, %v673_v54, 0.0  ;;  %v619_v62 = vmax.f32 %v611_v55, 0.0  ;;  %v614_v1 = vadd.f32 %v605_v51, %v556_v56  ;;  %v551_v63 = vadd.f32 %v550_v60, %v309_v59 }
 0x1db   :  { %v684_v2 = vadd.f32 %v683_v61, %v682_v57  ;;  %v676_v3 = vmul.f32 %v659_v52, %v620_v58  ;;  %v709_v26 = vsub.s32 0, %v708_v23 }
 0x1dc   :  { %v675_v4 = vmul.f32 %v654_v33, %v619_v62  ;;  %v622_v5 = vmax.f32 %v614_v1, 0.0  ;;  %v613_v6 = vadd.f32 %v600_v32, %v551_v63 }
 0x1dd   :  { %v686_v7 = vadd.f32 %v685_v0, %v684_v2  ;;  %v689_v13 = vsel %vm679_vm2, %v676_v3, 0.0  ;;  %v710_v30 = vrot.slane %v705_v28, %v709_v26 }
 0x1de   :  { %v687_v8 = vsel %vm679_vm2, %v675_v4, 0.0  ;;  %v621_v9 = vmax.f32 %v613_v6, 0.0  ;;  %v678_v14 = vmul.f32 %v669_v11, %v622_v5 }
 0x1df   :  { %v688_v12 = vadd.f32 %v687_v8, %v686_v7 }
 0x1e0   :  { %v677_v15 = vmul.f32 %v664_v10, %v621_v9  ;;  %v693_v19 = vsel %vm679_vm2, %v678_v14, 0.0 }
 0x1e1   :  { %v690_v16 = vadd.f32 %v689_v13, %v688_v12 }
 0x1e2   :  { %v691_v17 = vsel %vm679_vm2, %v677_v15, 0.0 }
 0x1e3   :  { %v692_v18 = vadd.f32 %v691_v17, %v690_v16 }
 0x1e5   :  { %v694_v21 = vadd.f32 %v693_v19, %v692_v18 }
 0x1e7   :  { %v695_v22 = vrot.slane %v694_v21, 4 }
 0x1e9   :  { %v696_v24 = vadd.f32 %v695_v22, %v694_v21 }
 0x1eb   :  { %v697_v25 = vrot.slane %v696_v24, 2 }
 0x1ed   :  { %v698_v27 = vadd.f32 %v697_v25, %v696_v24 }
 0x1ef   :  { %v699_v29 = vrot.slane %v698_v27, 1 }
 0x1f1   :  { %v700_v31 = vadd.f32 %v699_v29, %v698_v27 }
 0x1f3   :  { %v711_v32 = vadd.f32 %v710_v30, %v700_v31 }
 0x1f5   :  { %713 = vst.msk [vmem:[#allocation3] sm:$0x1] %vm712_vm3, %v711_v32 }
 0x1f6   :  { %905 = shalt.err (!%p902_p4)
}
 0x1f7   :  { %723 = dma.vmem_to_hbm [thread:$0]  %s721_s28, 16, %s1216_s7, [#allocation4]  }
 0x1f8   :  { %914 = dma.done.wait [#allocation4], 16  }
 0x1f9   :  { %915 = vsyncadd [#allocation4], 4294967280 }
 0x1fa   :  { %727 = vsyncpa [#allocation4], 1 }

</bundles_post_ra>
